<compile_context>
chip_gen: v7x
topology: tpu7x:2x2x1
jax: 0.10.0
libtpu: 0.0.40
codegen_flags: <defaults>
</compile_context>

<pallas_src>
import functools

import jax
import jax.numpy as jnp
from jax.experimental import pallas as pl
from jax.experimental.pallas import tpu as pltpu


def _round_up(x, m):
    return ((x + m - 1) // m) * m


def _layernorm_kernel(x_ref, g_ref, b_ref, o_ref, *, eps):
    # x_ref: (Nb, C, T) tile; g_ref / b_ref: (1, C, 1), resident in VMEM.
    x = x_ref[...].astype(jnp.float32)

    # Two-pass moments over the channel (sublane) axis: numerically matches
    # torch.var(dim=1, unbiased=False) even when |mean| >> std. The centered
    # tile `d` is reused for the output, so the second pass is free.
    mean = jnp.mean(x, axis=1, keepdims=True)        # (Nb, 1, T)
    d = x - mean
    var = jnp.mean(d * d, axis=1, keepdims=True)     # unbiased=False

    # PyTorch module semantics: (x - mean) / (sqrt(var) + eps) * g + b.
    inv = pl.reciprocal(jnp.sqrt(var) + eps)         # exact (1e-5 tolerance req.)

    g = g_ref[...].astype(jnp.float32)               # (1, C, 1)
    b = b_ref[...].astype(jnp.float32)
    o_ref[...] = (d * inv * g + b).astype(o_ref.dtype)


def _choose_tiling(N, C, HW, itemsize, *, target_block_bytes, min_block_bytes,
                   min_steps):
    """Pick (images-per-block, lane-tile, vmem_limit_bytes) with padding-aware math."""
    sublane = max(8, 32 // itemsize)       # 8 (f32) / 16 (bf16) / 32 (int8)
    c_pad = _round_up(C, sublane)          # Mosaic pads the sublane (C) axis
    c_pad_f32 = _round_up(C, 8)            # padding of in-kernel f32 temporaries

    # Per-step live VMEM per input-block byte:
    #   2x in + 2x out double buffers (input dtype) + ~3 full-tile f32 temps
    #   (upcast x, centered x, elementwise intermediate).
    f32_ratio = (c_pad_f32 * 4.0) / (c_pad * itemsize)
    live_factor = 4.0 + 3.0 * f32_ratio

    # Size blocks against the scoped limit we request (32 MiB: v7x scoped
    # default, safely below its 64 MiB physical VMEM; a raise vs v5e's 16 MiB).
    vmem_request = 32 * 1024 * 1024
    blk_target = min(target_block_bytes, int(0.7 * vmem_request / live_factor))
    # Never below one 128-lane tile (minimum legal lane block when HW > 128).
    # Very large C can exceed the target here; the vmem_limit below accounts for it.
    blk_target = max(blk_target, 128 * c_pad * itemsize)

    def block_bytes(nb, t_hw):
        return nb * c_pad * t_hw * itemsize

    def n_steps(nb, t_hw):
        return pl.cdiv(N, nb) * pl.cdiv(HW, t_hw)

    img_bytes = c_pad * HW * itemsize
    if img_bytes <= blk_target:
        # Small images: batch several per block so DMAs stay MiB-scale.
        nb = max(1, min(N, blk_target // img_bytes))
        t_hw = HW
    else:
        nb = 1
        cap = max(128, ((blk_target // (c_pad * itemsize)) // 128) * 128)
        t_hw = 0
        if HW % 128 == 0:
            # Prefer a multiple-of-128 divisor of HW under the cap (no ragged tail).
            d = cap
            while d >= 128:
                if HW % d == 0:
                    t_hw = d
                    break
                d -= 128
        if t_hw == 0:
            t_hw = cap  # accept a ragged last tile

    # Grow step count for pipeline overlap (and the 2 TCs on v7x), but keep
    # blocks above a floor so the ~0.35 us/step overhead stays negligible.
    while n_steps(nb, t_hw) < min_steps:
        if nb > 1 and block_bytes(max(1, nb // 2), t_hw) >= min_block_bytes:
            nb = max(1, nb // 2)
        else:
            new_t = max(128, ((t_hw // 2) // 128) * 128)
            if HW > 128 and new_t < t_hw and block_bytes(nb, new_t) >= min_block_bytes:
                t_hw = new_t
            else:
                break

    # Derive the scoped-VMEM request from the *actual* padded block, including
    # f32 temporaries, and clamp against physical VMEM when queryable.
    blk = block_bytes(nb, t_hw)
    f32_tile = nb * c_pad_f32 * t_hw * 4
    est_live = 4 * blk + 3 * f32_tile + (2 << 20)  # slack for params / internal scratch
    try:
        phys = int(pltpu.get_tpu_info().vmem_capacity_bytes)
    except Exception:
        phys = 64 * 1024 * 1024  # conservative: v7x per-TC physical VMEM
    vmem_limit = min(max(vmem_request, est_live), int(0.9 * phys))

    return nb, t_hw, vmem_limit


def layernorm_nchw(x, g, b, eps=1e-5, *,
                   target_block_bytes=2 * 1024 * 1024,
                   min_block_bytes=512 * 1024,
                   min_steps=8):
    """x: (N, C, H, W); g, b: (1, C, 1, 1). Returns (N, C, H, W)."""
    N, C, H, W = x.shape
    HW = H * W

    # Free views (no HBM traffic): NCHW -> (N, C, H*W), params -> (1, C, 1).
    # Spatial axis on lanes (lane-dense loads / unmasked stores); C on sublanes.
    x3 = x.reshape(N, C, HW)
    g3 = g.reshape(1, C, 1)
    b3 = b.reshape(1, C, 1)

    itemsize = jnp.dtype(x.dtype).itemsize
    nb, t_hw, vmem_limit = _choose_tiling(
        N, C, HW, itemsize,
        target_block_bytes=target_block_bytes,
        min_block_bytes=min_block_bytes,
        min_steps=min_steps)

    grid = (pl.cdiv(N, nb), pl.cdiv(HW, t_hw))

    out = pl.pallas_call(
        functools.partial(_layernorm_kernel, eps=eps),
        out_shape=jax.ShapeDtypeStruct((N, C, HW), x.dtype),
        grid_spec=pltpu.PrefetchScalarGridSpec(
            num_scalar_prefetch=0,
            grid=grid,
            in_specs=[
                pl.BlockSpec((nb, C, t_hw), lambda n, j: (n, 0, j)),
                pl.BlockSpec((1, C, 1), lambda n, j: (0, 0, 0)),   # resident
                pl.BlockSpec((1, C, 1), lambda n, j: (0, 0, 0)),   # resident
            ],
            out_specs=pl.BlockSpec((nb, C, t_hw), lambda n, j: (n, 0, j)),
        ),
        compiler_params=pltpu.CompilerParams(
            dimension_semantics=("parallel", "parallel"),
            vmem_limit_bytes=vmem_limit,
        ),
    )(x3, g3, b3)

    return out.reshape(N, C, H, W)


if __name__ == "__main__":
    key = jax.random.PRNGKey(0)
    N, C, H, W = 2, 4, 16, 16
    x = jax.random.normal(key, (N, C, H, W), dtype=jnp.float32)

    # Deterministic params matching nn.Parameter(torch.ones/zeros(1, dim, 1, 1)).
    g = jnp.ones((1, C, 1, 1), dtype=jnp.float32)
    b = jnp.zeros((1, C, 1, 1), dtype=jnp.float32)

    y = layernorm_nchw(x, g, b, eps=1e-5)
    jax.block_until_ready(y)

    # Pure-JAX reference with the same semantics as the PyTorch module.
    mean = jnp.mean(x, axis=1, keepdims=True)
    var = jnp.var(x, axis=1, keepdims=True)
    ref = (x - mean) / (jnp.sqrt(var) + 1e-5) * g + b
    assert jnp.allclose(y, ref, atol=1e-5, rtol=1e-5), "mismatch vs reference"

    print("KERNEL_OK")
</pallas_src>

<mosaic_0001>
module attributes {stable_mosaic.version = 11 : i64} {
  func.func @_layernorm_kernel(%arg0: i32, %arg1: i32, %arg2: memref<2x4x256xf32, #tpu.memory_space<vmem>>, %arg3: memref<1x4x1xf32, #tpu.memory_space<vmem>>, %arg4: memref<1x4x1xf32, #tpu.memory_space<vmem>>, %arg5: memref<2x4x256xf32, #tpu.memory_space<vmem>>) attributes {dimension_semantics = [#tpu.dimension_semantics<parallel>, #tpu.dimension_semantics<parallel>], iteration_bounds = array<i64: 1, 1>, scalar_prefetch = 0 : i64, scratch_operands = 0 : i64, tpu.core_type = #tpu.core_type<tc>, window_params = [{transform_indices = @transform_0, window_bounds = array<i64: 2, 4, 256>}, {pipeline_mode = #tpu.pipeline_mode<synchronous>, transform_indices = @transform_1, window_bounds = array<i64: 1, 4, 1>}, {pipeline_mode = #tpu.pipeline_mode<synchronous>, transform_indices = @transform_2, window_bounds = array<i64: 1, 4, 1>}, {transform_indices = @transform_3, window_bounds = array<i64: 2, 4, 256>}]} {
    %c0 = arith.constant 0 : index
    %c0_0 = arith.constant 0 : index
    %c0_1 = arith.constant 0 : index
    %0 = vector.load %arg2[%c0, %c0_0, %c0_1] : memref<2x4x256xf32, #tpu.memory_space<vmem>>, vector<2x4x256xf32>
    %cst = arith.constant dense<0.000000e+00> : vector<2x256xf32>
    %1 = vector.multi_reduction <add>, %0, %cst [1] : vector<2x4x256xf32> to vector<2x256xf32>
    %2 = vector.shape_cast %1 : vector<2x256xf32> to vector<2x1x256xf32>
    %cst_2 = arith.constant 4.000000e+00 : f32
    %3 = vector.broadcast %cst_2 : f32 to vector<2x1x256xf32>
    %4 = arith.divf %2, %3 : vector<2x1x256xf32>
    %5 = vector.broadcast %4 : vector<2x1x256xf32> to vector<2x4x256xf32>
    %6 = arith.subf %0, %5 : vector<2x4x256xf32>
    %7 = arith.mulf %6, %6 : vector<2x4x256xf32>
    %cst_3 = arith.constant dense<0.000000e+00> : vector<2x256xf32>
    %8 = vector.multi_reduction <add>, %7, %cst_3 [1] : vector<2x4x256xf32> to vector<2x256xf32>
    %9 = vector.shape_cast %8 : vector<2x256xf32> to vector<2x1x256xf32>
    %cst_4 = arith.constant 4.000000e+00 : f32
    %10 = vector.broadcast %cst_4 : f32 to vector<2x1x256xf32>
    %11 = arith.divf %9, %10 : vector<2x1x256xf32>
    %12 = math.sqrt %11 : vector<2x1x256xf32>
    %cst_5 = arith.constant 9.99999974E-6 : f32
    %13 = vector.broadcast %cst_5 : f32 to vector<2x1x256xf32>
    %14 = arith.addf %12, %13 : vector<2x1x256xf32>
    %15 = tpu.reciprocal %14 : vector<2x1x256xf32> -> vector<2x1x256xf32>
    %c0_6 = arith.constant 0 : index
    %c0_7 = arith.constant 0 : index
    %c0_8 = arith.constant 0 : index
    %16 = vector.load %arg3[%c0_6, %c0_7, %c0_8] : memref<1x4x1xf32, #tpu.memory_space<vmem>>, vector<1x4x1xf32>
    %c0_9 = arith.constant 0 : index
    %c0_10 = arith.constant 0 : index
    %c0_11 = arith.constant 0 : index
    %17 = vector.load %arg4[%c0_9, %c0_10, %c0_11] : memref<1x4x1xf32, #tpu.memory_space<vmem>>, vector<1x4x1xf32>
    %18 = vector.broadcast %15 : vector<2x1x256xf32> to vector<2x4x256xf32>
    %19 = arith.mulf %6, %18 : vector<2x4x256xf32>
    %20 = vector.broadcast %16 : vector<1x4x1xf32> to vector<2x4x256xf32>
    %21 = arith.mulf %19, %20 : vector<2x4x256xf32>
    %22 = vector.broadcast %17 : vector<1x4x1xf32> to vector<2x4x256xf32>
    %23 = arith.addf %21, %22 : vector<2x4x256xf32>
    %c0_12 = arith.constant 0 : index
    %c0_13 = arith.constant 0 : index
    %c0_14 = arith.constant 0 : index
    %24 = vector.load %arg5[%c0_12, %c0_13, %c0_14] : memref<2x4x256xf32, #tpu.memory_space<vmem>>, vector<2x4x256xf32>
    tpu.vector_store %arg5[%c0_12, %c0_13, %c0_14], %23 {strides = array<i32>} : memref<2x4x256xf32, #tpu.memory_space<vmem>>, vector<2x4x256xf32>,
    return
  }
  func.func @transform_0(%arg0: i32, %arg1: i32) -> (i32, i32, i32) {
    %c0_i32 = arith.constant 0 : i32
    %c0_i32_0 = arith.constant 0 : i32
    return %arg0, %c0_i32, %arg1 : i32, i32, i32
  }
  func.func @transform_1(%arg0: i32, %arg1: i32) -> (i32, i32, i32) {
    %c0_i32 = arith.constant 0 : i32
    %c0_i32_0 = arith.constant 0 : i32
    %c0_i32_1 = arith.constant 0 : i32
    %c0_i32_2 = arith.constant 0 : i32
    return %c0_i32, %c0_i32_0, %c0_i32_1 : i32, i32, i32
  }
  func.func @transform_2(%arg0: i32, %arg1: i32) -> (i32, i32, i32) {
    %c0_i32 = arith.constant 0 : i32
    %c0_i32_0 = arith.constant 0 : i32
    %c0_i32_1 = arith.constant 0 : i32
    %c0_i32_2 = arith.constant 0 : i32
    return %c0_i32, %c0_i32_0, %c0_i32_1 : i32, i32, i32
  }
  func.func @transform_3(%arg0: i32, %arg1: i32) -> (i32, i32, i32) {
    %c0_i32 = arith.constant 0 : i32
    %c0_i32_0 = arith.constant 0 : i32
    return %arg0, %c0_i32, %arg1 : i32, i32, i32
  }
}

</mosaic_0001>

<bundles_post_ra>
// kernel: tpu_custom_call.1
= control target key start
LH: loop header
LB: loop body
LE: loop exit
PB: predicated region body
PF: predicated region fallthrough
CT: control target
= control target key end

     0   :  { %8 = vsyncpa [#allocation3], 0  ;;  %s369_s0 = inlined_call_operand.hbm [shape: f32[2,4,256], index: 0, kind: input, shape index: {}]   ;;  %s370_s1 = inlined_call_operand.vmem [shape: f32[1,4,1], index: 1, kind: input, shape index: {}]   ;;  %s371_s2 = inlined_call_operand.vmem [shape: f32[1,4,1], index: 2, kind: input, shape index: {}]   ;;  %s372_s3 = inlined_call_operand.hbm [shape: f32[2,4,256], index: 3, kind: output, shape index: {}]  }
   0x1   :  { %9 = vsyncpa [#allocation4], 0  ;;  %s289_s12 = smov [#allocation2]   ;;  %s241_s16 = scalar_lea.hbm %s369_s0, 256 }
   0x2   :  { %s15_s13 = sshll.u32 %s289_s12, 4  ;;  %p242_p0 = scmp.ne.s32.totalorder %s369_s0, %s241_s16  ;;  %s16_s13 = int_to_ptr.vmem [resolvable:$true] %s15_s13 }
   0x3   :  { %p245_p1 = scmp.lt.u32.totalorder %s241_s16, %s369_s0 }
   0x5   :  { %p247_p2 = pnand %p245_p1, %p242_p0 }
   0x7   :  { %250 = shalt.err (!%p247_p2)
}
   0x8   :  { %s251_s21 = scalar_lea.vmem %s16_s13, 256  ;;  %p256_p4 = scmp.lt.s32.totalorder %s16_s13, %s16_s13 }
   0x9   :  { %p252_p3 = scmp.ne.s32.totalorder %s16_s13, %s251_s21  ;;  %p257_p5 = scmp.lt.s32.totalorder %s251_s21, %s251_s21 }
   0xb   :  { %p258_p6 = por %p257_p5, %p256_p4 }
   0xd   :  { %p259_p7 = pnand %p258_p6, %p252_p3 }
   0xf   :  { %262 = shalt.err (!%p259_p7)
}
  0x10   :  { %s290_s22 = smov 128   ;;  %s291_s23 = smov 8  }
  0x11   :  { %21 = dma.hbm_to_vmem [thread:$0]  %s369_s0, 256, %s16_s13, [#allocation3], %s290_s22, %s290_s22, %s291_s23  }
  0x12   :  { %285 = dma.done.wait [#allocation3], 256  }
  0x13   :  { %286 = vsyncadd [#allocation3], 4294967040  ;;  %v292_v0 = vmov 0   ;;  %v157_v1 = vld [vmem:[%s370_s1] sm:$0xf]  ;;  %v30_v3 = vld [vmem:[#allocation2 + $0x8] sm:$0xff] }
  0x14   :  { %222 = vset.pattern.permute.xlu0 %v292_v0  ;;  %v29_v2 = vld [vmem:[#allocation2] sm:$0xff]  ;;  %vm37_vm0 = vcmask 1043456   ;;  %v34_v6 = vcombine.high %v30_v3, %v30_v3  ;;  %s294_s0 = smov [#allocation5]  }
  0x15   :  { %171 = vperm.xlu0 %222, %v157_v1   ;;  %v158_v4 = vld [vmem:[%s371_s2] sm:$0xf]  ;;  %v33_v5 = vcombine.high %v29_v2, %v29_v2  ;;  %v38_v7 = vsel %vm37_vm0, %v29_v2, 0.0  ;;  %v52_v9 = vsel %vm37_vm0, %v30_v3, 0.0  ;;  %s204_s1 = sshll.u32 %s294_s0, 4  ;;  %s205_s1 = int_to_ptr.vmem [resolvable:$true] %s204_s1 }
  0x16   :  { %v59_v10 = vsel %vm37_vm0, %v34_v6, 0.0  ;;  %v39_v11 = vrot.slane %v38_v7, 4  ;;  %v53_v13 = vrot.slane %v52_v9, 4  ;;  %s263_s2 = scalar_lea.vmem %s205_s1, 256  ;;  %p268_p9 = scmp.lt.s32.totalorder %s205_s1, %s205_s1 }
  0x17   :  { %v45_v8 = vsel %vm37_vm0, %v33_v5, 0.0  ;;  %v60_v14 = vrot.slane %v59_v10, 4  ;;  %p264_p8 = scmp.ne.s32.totalorder %s205_s1, %s263_s2  ;;  %p269_p10 = scmp.lt.s32.totalorder %s263_s2, %s263_s2 }
  0x18   :  { %v46_v12 = vrot.slane %v45_v8, 4  ;;  %v40_v15 = vadd.f32 %v39_v11, %v38_v7  ;;  %v54_v17 = vadd.f32 %v53_v13, %v52_v9 }
  0x19   :  { %185 = vperm.xlu0 %222, %v158_v4   ;;  %v61_v18 = vadd.f32 %v60_v14, %v59_v10  ;;  %p270_p11 = por %p269_p10, %p268_p9 }
  0x1a   :  { %v47_v16 = vadd.f32 %v46_v12, %v45_v8  ;;  %v41_v19 = vrot.slane %v40_v15, 2  ;;  %v55_v21 = vrot.slane %v54_v17, 2 }
  0x1b   :  { %v62_v22 = vrot.slane %v61_v18, 2  ;;  %p271_p12 = pnand %p270_p11, %p264_p8 }
  0x1c   :  { %v48_v20 = vrot.slane %v47_v16, 2  ;;  %v42_v23 = vadd.f32 %v41_v19, %v40_v15  ;;  %v56_v25 = vadd.f32 %v55_v21, %v54_v17 }
  0x1d   :  { %v63_v26 = vadd.f32 %v62_v22, %v61_v18 }
  0x1e   :  { %v49_v24 = vadd.f32 %v48_v20, %v47_v16  ;;  %v43_v27 = vrot.slane %v42_v23, 1  ;;  %v57_v29 = vrot.slane %v56_v25, 1 }
  0x1f   :  { %v64_v30 = vrot.slane %v63_v26, 1 }
  0x20   :  { %v50_v28 = vrot.slane %v49_v24, 1  ;;  %v44_v31 = vadd.f32 %v43_v27, %v42_v23  ;;  %v58_v33 = vadd.f32 %v57_v29, %v56_v25 }
  0x21   :  { %v65_v34 = vadd.f32 %v64_v30, %v63_v26 }
  0x22   :  { %v51_v32 = vadd.f32 %v50_v28, %v49_v24  ;;  %v67_v35 = vmul.f32 0.25, %v44_v31  ;;  %v69_v37 = vmul.f32 0.25, %v58_v33 }
  0x23   :  { %v70_v38 = vmul.f32 0.25, %v65_v34 }
  0x24   :  { %v68_v36 = vmul.f32 0.25, %v51_v32 }
  0x25   :  { %v76_v40 = vcombine.low %v69_v37, %v70_v38 }
  0x26   :  { %v75_v39 = vcombine.low %v67_v35, %v68_v36 }
  0x27   :  { %v342_v42 = vsub.f32 %v30_v3, %v76_v40 }
  0x28   :  { %v340_v41 = vsub.f32 %v29_v2, %v75_v39  ;;  %v293_v39 = vmov 839922192  }
  0x29   :  { %v82_v44 = vmul.f32 %v342_v42, %v342_v42  ;;  %v174_v40 = vunpack.c.l.s4 %v293_v39 }
  0x2a   :  { %v81_v43 = vmul.f32 %v340_v41, %v340_v41 }
  0x2b   :  { %v86_v46 = vcombine.high %v82_v44, %v82_v44  ;;  %v103_v48 = vsel %vm37_vm0, %v82_v44, 0.0 }
  0x2c   :  { %v85_v45 = vcombine.high %v81_v43, %v81_v43  ;;  %v89_v47 = vsel %vm37_vm0, %v81_v43, 0.0  ;;  %v104_v52 = vrot.slane %v103_v48, 4  ;;  %v176_v43 = vlaneseq }
  0x2d   :  { %v90_v50 = vrot.slane %v89_v47, 4  ;;  %v110_v51 = vsel %vm37_vm0, %v86_v46, 0.0 }
  0x2e   :  { %v96_v49 = vsel %vm37_vm0, %v85_v45, 0.0  ;;  %v111_v54 = vrot.slane %v110_v51, 4  ;;  %v105_v56 = vadd.f32 %v104_v52, %v103_v48  ;;  %v177_v48 = vshrl.u32 %v176_v43, 7 }
  0x2f   :  { %v97_v53 = vrot.slane %v96_v49, 4  ;;  %v91_v55 = vadd.f32 %v90_v50, %v89_v47  ;;  %v175_v47 = vunpack.c.0.s8 %v174_v40 }
  0x30   :  { %v112_v58 = vadd.f32 %v111_v54, %v110_v51  ;;  %v106_v60 = vrot.slane %v105_v56, 2 }
  0x31   :  { %v98_v57 = vadd.f32 %v97_v53, %v96_v49  ;;  %v92_v59 = vrot.slane %v91_v55, 2  ;;  %v178_v50 = vsub.s32 %v175_v47, %v177_v48 }
  0x32   :  { %v113_v62 = vrot.slane %v112_v58, 2  ;;  %v107_v0 = vadd.f32 %v106_v60, %v105_v56 }
  0x33   :  { %v99_v61 = vrot.slane %v98_v57, 2  ;;  %v93_v63 = vadd.f32 %v92_v59, %v91_v55 }
  0x34   :  { %v114_v2 = vadd.f32 %v113_v62, %v112_v58  ;;  %v108_v4 = vrot.slane %v107_v0, 1 }
  0x35   :  { %v100_v1 = vadd.f32 %v99_v61, %v98_v57  ;;  %v94_v3 = vrot.slane %v93_v63, 1 }
  0x36   :  { %v115_v6 = vrot.slane %v114_v2, 1  ;;  %v109_v8 = vadd.f32 %v108_v4, %v107_v0 }
  0x37   :  { %v101_v5 = vrot.slane %v100_v1, 1  ;;  %v95_v7 = vadd.f32 %v94_v3, %v93_v63 }
  0x38   :  { %v116_v10 = vadd.f32 %v115_v6, %v114_v2  ;;  %v119_v12 = vmul.f32 0.25, %v109_v8 }
  0x39   :  { %v102_v9 = vadd.f32 %v101_v5, %v100_v1  ;;  %v117_v11 = vmul.f32 0.25, %v95_v7 }
  0x3a   :  { %v120_v14 = vmul.f32 0.25, %v116_v10  ;;  %vm137_vm2 = vcmp.eq.f32.partialorder %v119_v12, inf  ;;  %v140_v25 = vand.u32 2147483648, %v119_v12  ;;  %vm139_vm6 = vcmp.eq.f32.partialorder %v119_v12, 0.0 }
  0x3b   :  { %v118_v13 = vmul.f32 0.25, %v102_v9  ;;  %225 = vrsqrt.f32 %v117_v11  ;;  %vm123_vm1 = vcmp.eq.f32.partialorder %v117_v11, inf  ;;  %v126_v22 = vand.u32 2147483648, %v117_v11 }
  0x3c   :  { %227 = vrsqrt.f32 %v119_v12  ;;  %vm125_vm4 = vcmp.eq.f32.partialorder %v117_v11, 0.0  ;;  %vm144_vm5 = vcmp.eq.f32.partialorder %v120_v14, inf  ;;  %v147_v29 = vand.u32 2147483648, %v120_v14 }
  0x3d   :  { %229 = vrsqrt.f32 %v118_v13  ;;  %vm130_vm3 = vcmp.eq.f32.partialorder %v118_v13, inf  ;;  %v133_v26 = vand.u32 2147483648, %v118_v13  ;;  %vm132_vm7 = vcmp.eq.f32.partialorder %v118_v13, 0.0 }
  0x3e   :  { %231 = vrsqrt.f32 %v120_v14  ;;  %vm146_vm8 = vcmp.eq.f32.partialorder %v120_v14, 0.0 }
  0x45   :  { %v226_v15 = vpop.eup %225 }
  0x46   :  { %v228_v16 = vpop.eup %227  ;;  %v122_v19 = vmul.f32 %v226_v15, %v117_v11 }
  0x47   :  { %v230_v17 = vpop.eup %229  ;;  %v136_v20 = vmul.f32 %v228_v16, %v119_v12 }
  0x48   :  { %v232_v18 = vpop.eup %231  ;;  %v129_v21 = vmul.f32 %v230_v17, %v118_v13  ;;  %v124_v24 = vsel %vm123_vm1, %v117_v11, %v122_v19 }
  0x49   :  { %v143_v23 = vmul.f32 %v232_v18, %v120_v14  ;;  %v138_v27 = vsel %vm137_vm2, %v119_v12, %v136_v20  ;;  %v127_v30 = vsel %vm125_vm4, %v126_v22, %v124_v24 }
  0x4a   :  { %v131_v28 = vsel %vm130_vm3, %v118_v13, %v129_v21  ;;  %v141_v32 = vsel %vm139_vm6, %v140_v25, %v138_v27  ;;  %v149_v35 = vadd.f32 1e-05, %v127_v30 }
  0x4b   :  { %v145_v31 = vsel %vm144_vm5, %v120_v14, %v143_v23  ;;  %v134_v33 = vsel %vm132_vm7, %v133_v26, %v131_v28  ;;  %v151_v36 = vadd.f32 1e-05, %v141_v32 }
  0x4c   :  { %v148_v34 = vsel %vm146_vm8, %v147_v29, %v145_v31  ;;  %v150_v37 = vadd.f32 1e-05, %v134_v33  ;;  %233 = vrcp.f32 %v149_v35 }
  0x4d   :  { %v152_v38 = vadd.f32 1e-05, %v148_v34  ;;  %235 = vrcp.f32 %v151_v36 }
  0x4e   :  { %237 = vrcp.f32 %v150_v37 }
  0x4f   :  { %239 = vrcp.f32 %v152_v38 }
  0x56   :  { %v234_v44 = vpop.eup %233 }
  0x57   :  { %v236_v45 = vpop.eup %235 }
  0x58   :  { %v238_v46 = vpop.eup %237 }
  0x59   :  { %v240_v49 = vpop.eup %239  ;;  %v163_v51 = vcombine.low %v234_v44, %v238_v46 }
  0x5a   :  { %v164_v52 = vcombine.low %v236_v45, %v240_v49 }
  0x5b   :  { %v167_v54 = vmul.f32 %v163_v51, %v340_v41 }
  0x5c   :  { %v168_v55 = vmul.f32 %v164_v52, %v342_v42 }
  0x94   :  { %v172_v53 = vpop.permute.xlu0 %171 }
  0x95   :  { %v179_v56 = vrot.slane %v172_v53, %v178_v50 }
  0x97   :  { %v181_v58 = vmul.f32 %v179_v56, %v167_v54  ;;  %v182_v59 = vmul.f32 %v179_v56, %v168_v55 }
  0x98   :  { %v186_v57 = vpop.permute.xlu0 %185 }
  0x99   :  { %v193_v60 = vrot.slane %v186_v57, %v178_v50 }
  0x9b   :  { %v195_v61 = vadd.f32 %v193_v60, %v181_v58  ;;  %v196_v62 = vadd.f32 %v193_v60, %v182_v59 }
  0x9d   :  { %197 = vst [vmem:[#allocation5] sm:$0xff] %v195_v61  ;;  %198 = vst [vmem:[#allocation5 + $0x8] sm:$0xff] %v196_v62 }
  0x9e   :  { %274 = shalt.err (!%p271_p12)
}
  0x9f   :  { %s275_s5 = scalar_lea.hbm %s372_s3, 256 }
  0xa0   :  { %p276_p13 = scmp.ne.s32.totalorder %s372_s3, %s275_s5  ;;  %p279_p0 = scmp.lt.u32.totalorder %s275_s5, %s372_s3 }
  0xa2   :  { %p281_p1 = pnand %p279_p0, %p276_p13 }
  0xa4   :  { %284 = shalt.err (!%p281_p1)
}
  0xa5   :  { %210 = dma.vmem_to_hbm [thread:$0]  %s205_s1, 256, %s372_s3, [#allocation4], %s290_s22, %s290_s22, %s291_s23  }
  0xa6   :  { %287 = dma.done.wait [#allocation4], 256  }
  0xa7   :  { %288 = vsyncadd [#allocation4], 4294967040 }
  0xa8   :  { %214 = vsyncpa [#allocation3], 1 }
  0xa9   :  { %215 = vsyncpa [#allocation4], 1 }

</bundles_post_ra>
